<compile_context>
chip_gen: v5e
topology: v5e:2x2
jax: 0.10.0
libtpu: 0.0.40
codegen_flags: <defaults>
</compile_context>

<pallas_src>
import functools
from typing import NamedTuple

import jax
import jax.numpy as jnp
from jax.experimental import pallas as pl
from jax.experimental.pallas import tpu as pltpu


def _round_up(n, m):
    return ((n + m - 1) // m) * m


def _pick_tile(dim, candidates):
    for c in candidates:
        if dim >= c and dim % c == 0:
            return c
    return dim  # full dimension is always a legal block extent


def _default_vmem_limit_bytes():
    # Budget the scoped VMEM from the chip's physical capacity (v7x has only 64 MiB
    # per TensorCore; v5e/v6e have 128 MiB).  Conservative fallback if the query fails.
    try:
        cap = int(pltpu.get_tpu_info().vmem_capacity_bytes)
        return min(96 * 1024 * 1024, max(32 * 1024 * 1024, int(cap * 0.6)))
    except Exception:
        return 32 * 1024 * 1024


class LoRAParams(NamedTuple):
    w_t: jax.Array       # [din_p, dout_p] compute_dtype, pre-transposed base weight
    bias: jax.Array      # [1, dout_p]     float32
    a_pad: jax.Array     # [rp, din_p]     compute_dtype, rank-padded lora_A weight
    b_scaled: jax.Array  # [rp, dout_p]    compute_dtype, rank-padded, (rank/alpha) folded
    din: int
    dout: int
    din_p: int
    dout_p: int
    rp: int


def prepare_lora_params(base_weight, base_bias, lora_A_weight, lora_B, rank, alpha,
                        *, compute_dtype=jnp.bfloat16):
    """One-time (load-time) weight prep: cast, pad, transpose, fold LoRA scale."""
    dout, din = base_weight.shape
    assert lora_A_weight.shape == (rank, din)
    assert lora_B.shape == (rank, dout)
    assert base_bias.shape == (dout,)

    din_p = _round_up(din, 128)
    dout_p = _round_up(dout, 128)
    rp = max(128, _round_up(rank, 128))   # lane-dense rank axis; padded rows are zero

    # Pre-transposed W -> plain NN matmul in the kernel (no per-tile transposes).
    w_t = jnp.zeros((din_p, dout_p), compute_dtype)
    w_t = w_t.at[:din, :dout].set(base_weight.T.astype(compute_dtype))

    bias = jnp.zeros((1, dout_p), jnp.float32)
    bias = bias.at[0, :dout].set(base_bias.astype(jnp.float32))

    a_pad = jnp.zeros((rp, din_p), compute_dtype)
    a_pad = a_pad.at[:rank, :din].set(lora_A_weight.astype(compute_dtype))

    scale = float(rank) / float(alpha)    # matches the PyTorch module: B * (rank/alpha)
    b_scaled = jnp.zeros((rp, dout_p), compute_dtype)
    b_scaled = b_scaled.at[:rank, :dout].set((lora_B * scale).astype(compute_dtype))

    return LoRAParams(w_t, bias, a_pad, b_scaled, din, dout, din_p, dout_p, rp)


def _lora_kernel(x_ref, wt_ref, bias_ref, xa_ref, b_ref, o_ref, acc_ref):
    """Grid = (i over batch tiles, j over dout tiles, k over din tiles), k innermost.

    acc_ref : [tm, tn] f32 per-(i, j) base-GEMM accumulator (init at k==0,
              finalized with bias + LoRA up-projection at k==last).
    """
    k = pl.program_id(2)

    @pl.when(k == 0)
    def _():
        acc_ref[...] = jnp.zeros_like(acc_ref)

    # Base GEMM partial: x_tile [tm, tk] @ W^T_tile [tk, tn] — plain NN MXU matmul.
    acc_ref[...] += jnp.dot(x_ref[...], wt_ref[...],
                            preferred_element_type=jnp.float32)

    @pl.when(k == pl.num_programs(2) - 1)
    def _():
        # LoRA up-projection on the precomputed down-projection (dropout = identity
        # in eval mode); rank/alpha already folded into b_ref by the wrapper.
        lora = jnp.dot(xa_ref[...], b_ref[...],
                       preferred_element_type=jnp.float32)           # [tm, tn]
        o_ref[...] = (acc_ref[...] + bias_ref[...] + lora).astype(o_ref.dtype)


def lora_layer_forward(x, params: LoRAParams, *, tm=None, tn=None, tk=None):
    """x: [..., din].  Returns [..., dout] in x.dtype."""
    orig_shape = x.shape
    din = orig_shape[-1]
    assert din == params.din
    x2 = x.reshape(-1, din)
    batch = x2.shape[0]

    cdtype = params.w_t.dtype
    batch_p = _round_up(batch, 8)

    # Pad activations to the (8, 128)-aligned problem; padded rows/cols are zero.
    x_c = jnp.zeros((batch_p, params.din_p), cdtype)
    x_c = x_c.at[:batch, :din].set(x2.astype(cdtype))

    # LoRA down-projection x @ A^T as a tiny XLA GEMM (rank/din of base FLOPs).
    # Keeps A out of the kernel's DMA stream entirely and frees j to be 'parallel'.
    xa = jnp.dot(x_c, params.a_pad.T,
                 preferred_element_type=jnp.float32).astype(cdtype)   # [batch_p, rp]

    # Tile sizes: 256/1024-class defaults keep the 256-wide MXUs on v6e/v7x full and
    # minimize W/x re-streaming; small problems fall back to smaller legal tiles.
    tm = tm or _pick_tile(batch_p, (512, 256, 128, 64, 32, 16, 8))
    tn = tn or _pick_tile(params.dout_p, (1024, 512, 256, 128))
    tk = tk or _pick_tile(params.din_p, (1024, 512, 256, 128))
    assert batch_p % tm == 0 and (tm % 8 == 0 or tm == batch_p)
    assert params.dout_p % tn == 0 and tn % 128 == 0
    assert params.din_p % tk == 0 and tk % 128 == 0

    grid = (batch_p // tm, params.dout_p // tn, params.din_p // tk)
    rp = params.rp

    def _nbytes(a):
        return int(a.size) * int(a.dtype.itemsize)

    cost = pl.CostEstimate(
        flops=(2 * batch_p * params.din_p * params.dout_p
               + 2 * batch_p * rp * params.dout_p),
        transcendentals=0,
        bytes_accessed=(_nbytes(x_c) + _nbytes(params.w_t) + _nbytes(params.bias)
                        + _nbytes(xa) + _nbytes(params.b_scaled)
                        + batch_p * params.dout_p * int(jnp.dtype(x.dtype).itemsize)),
    )

    out = pl.pallas_call(
        _lora_kernel,
        out_shape=jax.ShapeDtypeStruct((batch_p, params.dout_p), x.dtype),
        grid_spec=pltpu.PrefetchScalarGridSpec(
            num_scalar_prefetch=0,
            grid=grid,
            in_specs=[
                pl.BlockSpec((tm, tk), lambda i, j, k: (i, k)),    # x
                pl.BlockSpec((tk, tn), lambda i, j, k: (k, j)),    # W^T  [din_p, dout_p]
                pl.BlockSpec((1, tn), lambda i, j, k: (0, j)),     # bias (f32)
                pl.BlockSpec((tm, rp), lambda i, j, k: (i, 0)),    # x@A^T (j/k invariant)
                pl.BlockSpec((rp, tn), lambda i, j, k: (0, j)),    # B*(rank/alpha)
            ],
            out_specs=pl.BlockSpec((tm, tn), lambda i, j, k: (i, j)),
            scratch_shapes=[
                pltpu.VMEM((tm, tn), jnp.float32),   # base-GEMM f32 accumulator
            ]),
        compiler_params=pltpu.CompilerParams(
            # i and j shard across TensorCores (megacore); k is the reduction axis.
            dimension_semantics=("parallel", "parallel", "arbitrary"),
            vmem_limit_bytes=_default_vmem_limit_bytes()),
        cost_estimate=cost,
    )(x_c, params.w_t, params.bias, xa, params.b_scaled)

    out = out[:batch, :params.dout]
    return out.reshape(orig_shape[:-1] + (params.dout,))


def lora_layer_reference(x, base_weight, base_bias, lora_A_weight, lora_B, rank, alpha):
    """Pure-JAX f32 reference mirroring the PyTorch forward (eval-mode dropout)."""
    lora_A_output = x @ lora_A_weight.T
    lora_B_output = lora_A_output @ (lora_B * (rank / alpha))
    return x @ base_weight.T + base_bias + lora_B_output


if __name__ == "__main__":
    batch = 32
    in_features = 256
    out_features = 384
    rank = 8
    alpha = 16.0

    key = jax.random.PRNGKey(0)
    kx, kw, kb, ka, kB = jax.random.split(key, 5)

    x = jax.random.normal(kx, (batch, in_features), dtype=jnp.float32)
    base_weight = jax.random.normal(kw, (out_features, in_features), jnp.float32) * 0.1
    base_bias = jax.random.normal(kb, (out_features,), jnp.float32) * 0.1
    lora_A_weight = jax.random.normal(ka, (rank, in_features), jnp.float32) * 0.1
    # PyTorch __init__ zero-inits lora_B; use nonzero values so the LoRA path is exercised.
    lora_B = jax.random.normal(kB, (rank, out_features), jnp.float32) * 0.1

    ref = lora_layer_reference(x, base_weight, base_bias, lora_A_weight, lora_B,
                               rank, alpha)

    # f32 MXU path with explicit small tiles so the demo exercises a real
    # (i, j, k) = (2, 3, 2) grid; tight tolerance.
    params_f32 = prepare_lora_params(base_weight, base_bias, lora_A_weight, lora_B,
                                     rank, alpha, compute_dtype=jnp.float32)
    out = lora_layer_forward(x, params_f32, tm=16, tn=128, tk=128)
    out = jax.block_until_ready(out)
    assert out.shape == (batch, out_features)
    assert jnp.allclose(out, ref, atol=1e-4, rtol=1e-4), "f32 mismatch vs reference"

    # Default serving path: bf16 MXU feed (f32 accumulation), default tile selection.
    params_bf16 = prepare_lora_params(base_weight, base_bias, lora_A_weight, lora_B,
                                      rank, alpha)
    out_bf16 = lora_layer_forward(x, params_bf16)
    out_bf16 = jax.block_until_ready(out_bf16)
    assert out_bf16.shape == (batch, out_features)
    assert jnp.allclose(out_bf16, ref, atol=1e-1, rtol=5e-2), "bf16 mismatch vs reference"

    print("KERNEL_OK")
</pallas_src>

<mosaic_0001>
module attributes {stable_mosaic.version = 11 : i64} {
  func.func @_lora_kernel(%arg0: i32, %arg1: i32, %arg2: i32, %arg3: memref<16x128xf32, #tpu.memory_space<vmem>>, %arg4: memref<128x128xf32, #tpu.memory_space<vmem>>, %arg5: memref<1x128xf32, #tpu.memory_space<vmem>>, %arg6: memref<16x128xf32, #tpu.memory_space<vmem>>, %arg7: memref<128x128xf32, #tpu.memory_space<vmem>>, %arg8: memref<16x128xf32, #tpu.memory_space<vmem>>, %arg9: memref<16x128xf32, #tpu.memory_space<vmem>>) attributes {dimension_semantics = [#tpu.dimension_semantics<parallel>, #tpu.dimension_semantics<parallel>, #tpu.dimension_semantics<arbitrary>], iteration_bounds = array<i64: 2, 3, 2>, scalar_prefetch = 0 : i64, scratch_operands = 1 : i64, tpu.core_type = #tpu.core_type<tc>, window_params = [{transform_indices = @transform_0, window_bounds = array<i64: 16, 128>}, {transform_indices = @transform_1, window_bounds = array<i64: 128, 128>}, {transform_indices = @transform_2, window_bounds = array<i64: 1, 128>}, {transform_indices = @transform_3, window_bounds = array<i64: 16, 128>}, {transform_indices = @transform_4, window_bounds = array<i64: 128, 128>}, {transform_indices = @transform_5, window_bounds = array<i64: 16, 128>}]} {
    %c0_i32 = arith.constant 0 : i32
    %0 = arith.cmpi eq, %arg2, %c0_i32 : i32
    %1 = arith.extui %0 : i1 to i32
    %c0_i32_0 = arith.constant 0 : i32
    %2 = arith.cmpi ne, %1, %c0_i32_0 : i32
    scf.if %2 {
      %cst_9 = arith.constant 0.000000e+00 : f32
      %12 = vector.broadcast %cst_9 : f32 to vector<16x128xf32>
      %c0_10 = arith.constant 0 : index
      %c0_11 = arith.constant 0 : index
      %13 = vector.load %arg9[%c0_10, %c0_11] : memref<16x128xf32, #tpu.memory_space<vmem>>, vector<16x128xf32>
      tpu.vector_store %arg9[%c0_10, %c0_11], %12 {strides = array<i32>} : memref<16x128xf32, #tpu.memory_space<vmem>>, vector<16x128xf32>,
    } else {
    }
    %c0 = arith.constant 0 : index
    %c0_1 = arith.constant 0 : index
    %3 = vector.load %arg9[%c0, %c0_1] : memref<16x128xf32, #tpu.memory_space<vmem>>, vector<16x128xf32>
    %c0_2 = arith.constant 0 : index
    %c0_3 = arith.constant 0 : index
    %4 = vector.load %arg3[%c0_2, %c0_3] : memref<16x128xf32, #tpu.memory_space<vmem>>, vector<16x128xf32>
    %c0_4 = arith.constant 0 : index
    %c0_5 = arith.constant 0 : index
    %5 = vector.load %arg4[%c0_4, %c0_5] : memref<128x128xf32, #tpu.memory_space<vmem>>, vector<128x128xf32>
    %cst = arith.constant dense<0.000000e+00> : vector<16x128xf32>
    %6 = tpu.matmul %4, %5, %cst {dimension_numbers = #tpu.dot_dimension_numbers<[1], [0], [0], [1], [0, 0, 1, 1], [], []>} : vector<16x128xf32>, vector<128x128xf32>, vector<16x128xf32> -> vector<16x128xf32>
    %7 = arith.addf %3, %6 : vector<16x128xf32>
    %c0_6 = arith.constant 0 : index
    %c0_7 = arith.constant 0 : index
    %8 = vector.load %arg9[%c0_6, %c0_7] : memref<16x128xf32, #tpu.memory_space<vmem>>, vector<16x128xf32>
    tpu.vector_store %arg9[%c0_6, %c0_7], %7 {strides = array<i32>} : memref<16x128xf32, #tpu.memory_space<vmem>>, vector<16x128xf32>,
    %c1_i32 = arith.constant 1 : i32
    %9 = arith.cmpi eq, %arg2, %c1_i32 : i32
    %10 = arith.extui %9 : i1 to i32
    %c0_i32_8 = arith.constant 0 : i32
    %11 = arith.cmpi ne, %10, %c0_i32_8 : i32
    scf.if %11 {
      %c0_9 = arith.constant 0 : index
      %c0_10 = arith.constant 0 : index
      %12 = vector.load %arg6[%c0_9, %c0_10] : memref<16x128xf32, #tpu.memory_space<vmem>>, vector<16x128xf32>
      %c0_11 = arith.constant 0 : index
      %c0_12 = arith.constant 0 : index
      %13 = vector.load %arg7[%c0_11, %c0_12] : memref<128x128xf32, #tpu.memory_space<vmem>>, vector<128x128xf32>
      %cst_13 = arith.constant dense<0.000000e+00> : vector<16x128xf32>
      %14 = tpu.matmul %12, %13, %cst_13 {dimension_numbers = #tpu.dot_dimension_numbers<[1], [0], [0], [1], [0, 0, 1, 1], [], []>} : vector<16x128xf32>, vector<128x128xf32>, vector<16x128xf32> -> vector<16x128xf32>
      %c0_14 = arith.constant 0 : index
      %c0_15 = arith.constant 0 : index
      %15 = vector.load %arg9[%c0_14, %c0_15] : memref<16x128xf32, #tpu.memory_space<vmem>>, vector<16x128xf32>
      %c0_16 = arith.constant 0 : index
      %c0_17 = arith.constant 0 : index
      %16 = vector.load %arg5[%c0_16, %c0_17] : memref<1x128xf32, #tpu.memory_space<vmem>>, vector<1x128xf32>
      %17 = vector.broadcast %16 : vector<1x128xf32> to vector<16x128xf32>
      %18 = arith.addf %15, %17 : vector<16x128xf32>
      %19 = arith.addf %18, %14 : vector<16x128xf32>
      %c0_18 = arith.constant 0 : index
      %c0_19 = arith.constant 0 : index
      %20 = vector.load %arg8[%c0_18, %c0_19] : memref<16x128xf32, #tpu.memory_space<vmem>>, vector<16x128xf32>
      tpu.vector_store %arg8[%c0_18, %c0_19], %19 {strides = array<i32>} : memref<16x128xf32, #tpu.memory_space<vmem>>, vector<16x128xf32>,
    } else {
    }
    return
  }
  func.func @transform_0(%arg0: i32, %arg1: i32, %arg2: i32) -> (i32, i32) {
    %c0_i32 = arith.constant 0 : i32
    return %arg0, %arg2 : i32, i32
  }
  func.func @transform_1(%arg0: i32, %arg1: i32, %arg2: i32) -> (i32, i32) {
    %c0_i32 = arith.constant 0 : i32
    return %arg2, %arg1 : i32, i32
  }
  func.func @transform_2(%arg0: i32, %arg1: i32, %arg2: i32) -> (i32, i32) {
    %c0_i32 = arith.constant 0 : i32
    %c0_i32_0 = arith.constant 0 : i32
    return %c0_i32, %arg1 : i32, i32
  }
  func.func @transform_3(%arg0: i32, %arg1: i32, %arg2: i32) -> (i32, i32) {
    %c0_i32 = arith.constant 0 : i32
    %c0_i32_0 = arith.constant 0 : i32
    return %arg0, %c0_i32 : i32, i32
  }
  func.func @transform_4(%arg0: i32, %arg1: i32, %arg2: i32) -> (i32, i32) {
    %c0_i32 = arith.constant 0 : i32
    %c0_i32_0 = arith.constant 0 : i32
    return %c0_i32, %arg1 : i32, i32
  }
  func.func @transform_5(%arg0: i32, %arg1: i32, %arg2: i32) -> (i32, i32) {
    %c0_i32 = arith.constant 0 : i32
    return %arg0, %arg1 : i32, i32
  }
}

</mosaic_0001>

<bundles_post_ra>
// kernel: tpu_custom_call.1
= control target key start
LH: loop header
LB: loop body
LE: loop exit
PB: predicated region body
PF: predicated region fallthrough
CT: control target
= control target key end

     0   :  { %s1942_s0 = inlined_call_operand.hbm [shape: f32[32,256], index: 0, kind: input, shape index: {}]   ;;  %s1943_s1 = inlined_call_operand.hbm [shape: f32[256,384], index: 1, kind: input, shape index: {}]   ;;  %s1944_s2 = inlined_call_operand.hbm [shape: f32[1,384], index: 2, kind: input, shape index: {}]   ;;  %s1945_s3 = inlined_call_operand.hbm [shape: f32[32,128], index: 3, kind: input, shape index: {}]   ;;  %s1946_s4 = inlined_call_operand.hbm [shape: f32[128,384], index: 4, kind: input, shape index: {}]   ;;  %s1947_s5 = inlined_call_operand.hbm [shape: f32[32,384], index: 5, kind: output, shape index: {}]  }
   0x1   :  { %1976 = sst [smem:[#allocation43_spill]] %s1942_s0 }
   0x2   :  { %1977 = sst [smem:[#allocation44_spill]] %s1943_s1 }
   0x3   :  { %1978 = sst [smem:[#allocation45_spill]] %s1944_s2 }
   0x4   :  { %1979 = sst [smem:[#allocation46_spill]] %s1945_s3 }
   0x5   :  { %1980 = sst [smem:[#allocation47_spill]] %s1946_s4 }
   0x6   :  { %1981 = sst [smem:[#allocation48_spill]] %s1947_s5 }
   0x7   :  { %10 = vsyncpa [#allocation4], 0 }
   0x8   :  { %12 = vsyncpa [#allocation4 + $0x1], 0 }
   0x9   :  { %13 = vsyncpa [#allocation7], 0 }
   0xa   :  { %15 = vsyncpa [#allocation7 + $0x1], 0 }
   0xb   :  { %16 = vsyncpa [#allocation10], 0 }
   0xc   :  { %18 = vsyncpa [#allocation10 + $0x1], 0 }
   0xd   :  { %19 = vsyncpa [#allocation5], 0 }
   0xe   :  { %21 = vsyncpa [#allocation5 + $0x1], 0  ;;  %s1440_s18 = smov 0   ;;  %s1442_s19 = smov 0  }
   0xf   :  { %s1444_s20 = smov 0   ;;  %s1446_s21 = smov 0  }
  0x10   :  { %s1448_s22 = smov 0   ;;  %s1450_s23 = smov 0  }
  0x11   :  { %s1452_s24 = smov 0   ;;  %s1454_s25 = smov 0  }
  0x12   :  { %s1456_s26 = smov 0   ;;  %s1458_s27 = smov 0  }
  0x13   :  { %s1460_s28 = smov 0   ;;  %s1462_s29 = smov 0  }
  0x14   :  { %s1464_s30 = smov 0   ;;  %s1466_s6 = smov 0  }
  0x15   :  { %s1468_s7 = smov 0   ;;  %s1470_s8 = smov 0  }
  0x16   :  { %s1472_s9 = smov 0   ;;  %s1474_s10 = smov 0  }
  0x17   :  { %s1476_s11 = smov 0   ;;  %s1478_s12 = smov 0  }
  0x18   :  { %s1480_s13 = smov 0   ;;  %s1482_s14 = smov 0  }
  0x19 LB: > { %1982 = sst [smem:[#allocation19_spill]] %s1316_s18  ;;  %s1549_s15 = sadd.s32 4294967295, %s1400_s14   ;;  %s1400_s14 = sphi %s1482_s14, %s27_s14   ;;  %s1396_s13 = sphi %s1480_s13, %s2077_s13   ;;  %s1392_s12 = sphi %s1478_s12, %s2076_s12   ;;  %s1388_s11 = sphi %s1476_s11, %s2075_s11   ;;  %s1384_s10 = sphi %s1474_s10, %s2063_s10   ;;  %s1380_s9 = sphi %s1472_s9, %s2074_s9   ;;  %s1376_s8 = sphi %s1470_s8, %s2073_s8   ;;  %s1372_s7 = sphi %s1468_s7, %s2062_s7   ;;  %s1368_s6 = sphi %s1466_s6, %s2072_s6   ;;  %s1364_s30 = sphi %s1464_s30, %s2071_s30   ;;  %s1360_s29 = sphi %s1462_s29, %s2060_s29   ;;  %s1356_s28 = sphi %s1460_s28, %s2059_s28   ;;  %s1352_s27 = sphi %s1458_s27, %s2070_s27   ;;  %s1348_s26 = sphi %s1456_s26, %s2069_s26   ;;  %s1344_s25 = sphi %s1454_s25, %s2057_s25   ;;  %s1340_s24 = sphi %s1452_s24, %s2056_s24   ;;  %s1336_s23 = sphi %s1450_s23, %s2055_s23   ;;  %s1332_s22 = sphi %s1448_s22, %s2067_s22   ;;  %s1328_s21 = sphi %s1446_s21, %s2065_s21   ;;  %s1324_s20 = sphi %s1444_s20, %s2053_s20   ;;  %s1320_s19 = sphi %s1442_s19, %s2052_s19   ;;  %s1316_s18 = sphi %s1440_s18, %s2051_s18  }
  0x1a   : > { %1983 = sst [smem:[#allocation20_spill]] %s1320_s19  ;;  %s39_s16 = sadd.s32 1, %s1388_s11 }
  0x1b   : > { %1984 = sst [smem:[#allocation21_spill]] %s1324_s20  ;;  %p40_p0 = scmp.ge.s32.totalorder %s39_s16, 2 }
  0x1c   : > { %1985 = sst [smem:[#allocation22_spill]] %s1336_s23  ;;  %s42_s17 = sadd.s32 1, %s1392_s12 }
  0x1d   : > { %1986 = sst [smem:[#allocation23_spill]] %s1340_s24  ;;  %p1962_p1 = scmp.eq.s32.totalorder %s1400_s14, 0 }
  0x1e   : > { %1987 = sst [smem:[#allocation24_spill]] %s1344_s25  ;;  %p1961_p2 = scmp.eq.s32.totalorder %s1549_s15, 0 }
  0x1f   : > { %1988 = sst [smem:[#allocation25_spill]] %s1348_s26  ;;  %s2079_s16 = smov (%p40_p0, %s39_s16), 0 }
  0x20   : > { %1989 = sst [smem:[#allocation26_spill]] %s1356_s28  ;;  %s2081_s17 = smov (!%p40_p0, %s42_s17), %s1392_s12 }
  0x21   : > { %1990 = sst [smem:[#allocation27_spill]] %s1360_s29  ;;  %s1562_s5 = ssub.s32 %s1388_s11, %s2079_s16 }
  0x22   : > { %1991 = sst [smem:[#allocation28_spill]] %s1372_s7  ;;  %p44_p3 = scmp.ge.s32.totalorder %s2081_s17, 3 }
  0x23   : > { %1992 = sst [smem:[#allocation29_spill]] %s1376_s8  ;;  %p90_p4 = scmp.ne.s32.totalorder %s1360_s29, %s1356_s28 }
  0x24   : > { %1993 = sst [smem:[#allocation30_spill]] %s1380_s9  ;;  %s83_s9 = sadd.s32 1, %s1360_s29 }
  0x25   : > { %1994 = sst [smem:[#allocation31_spill]] %s1384_s10  ;;  %p96_p5 = scmp.ne.s32.totalorder %s1356_s28, %s1352_s27 }
  0x26   : > { %1995 = sst [smem:[#allocation32_spill]] %s1396_s13  ;;  %p200_p6 = scmp.eq.s32.totalorder %s1549_s15, 11 }
  0x27   : > { %1996 = sst [smem:[#allocation33_spill]] %s2079_s16  ;;  %p92_p7 = por %p90_p4, %p1962_p1 }
  0x28   : > { %s1573_s10 = scalar_select %p44_p3, 0, %s2081_s17  }
  0x29   : > { %p1579_p8 = por %p96_p5, %p1961_p2  ;;  %p837_p9 = scmp.lt.s32.totalorder %s1400_s14, 12 }
  0x2a   : > { %1997 = sst [smem:[#allocation34_spill]] %s1573_s10  ;;  %s1585_s16 = ssub.s32 %s1392_s12, %s1573_s10 }
  0x2b   : > { %s1998_s8 = scalar_select %p1579_p8, 1, 0 }
  0x2c   : > { %s80_s4 = sor.u32 %s1585_s16, %s1562_s5  ;;  %s252_s2 = sand.u32 1, %s1360_s29  }
  0x2d   : > { %1999 = sst [smem:[#allocation35_spill]] %s1998_s8  ;;  %p81_p10 = scmp.eq.s32.totalorder %s80_s4, 0 }
  0x2e   : > { %s746_s0 = sshll.u32 %s252_s2, 7  ;;  %s803_s24 = smul.u32 48, %s1388_s11 }
  0x2f   : > { %s1592_s28 = scalar_select %p81_p10, %s1360_s29, %s83_s9  }
  0x30   : > { %p1598_p11 = pnand %p837_p9, %p92_p7  ;;  %s259_s10 = sadd.s32 %s1392_s12, %s803_s24 }
  0x31   : > { %2000 = sst [smem:[#allocation36_spill]] %s1592_s28  ;;  %s254_s8 = scalar_lea.vmem [#allocation6], %s746_s0 }
  0x32   : > { %s264_s26 = sshll.u32 %s254_s8, 4  ;;  %s749_s4 = sshll.u32 %s259_s10, 3  ;;  %s265_s26 = int_to_ptr.vmem [resolvable:$true] %s264_s26 }
  0x33   : > { %s2002_s1 = sld [smem:[#allocation44_spill]]  ;;  %p755_p12 = scmp.ge.s32.totalorder %s1400_s14, 1 }
  0x34   : > { %s2003_s0 = sand.u32 1, %s1400_s14   ;;  %s1956_s8 = smov 384  }
  0x35   : > { %s1609_s24 = scalar_lea.sflag [#allocation7], %s2003_s0  ;;  %s1957_s10 = smov 128  }
  0x36   : > { %s1959_s9 = smov 8   ;;  %p332_p13 = scmp.lt.s32.totalorder %s1400_s14, 13 }
  0x37   : > { %s46_s2 = sadd.s32 1, %s1396_s13  ;;  %s135_s25 = sadd.s32 1, %s1336_s23 }
  0x38   : > { %p1618_p0 = pnand %p755_p12, %p332_p13  ;;  %s2083_s2 = smov (!%p44_p3, %s46_s2), %s1396_s13 }
  0x39   : > { %s261_s27 = scalar_lea.hbm %s2002_s1, %s749_s4  ;;  %s739_s4 = sadd.s32 4294967294, %s1400_s14  }
  0x3a   : > { %s262_s28 = sshll.u32 %s261_s27, 4  ;;  %p142_p4 = scmp.ne.s32.totalorder %s1336_s23, %s1332_s22  ;;  %s263_s28 = int_to_ptr.hbm [resolvable:$true] %s262_s28 }
  0x3b   : > { %823 = dma.hbm_to_vmem [thread:$0]  (!%p1598_p11), %s263_s28, 2048, %s265_s26, %s1609_s24, %s1956_s8, %s1957_s10, %s1959_s9  }
  0x3c   : > { %p48_p5 = scmp.ge.s32.totalorder %s2083_s2, 2  ;;  %p148_p7 = scmp.ne.s32.totalorder %s1332_s22, %s1328_s21 }
  0x3d   : > { %p1634_p10 = por %p142_p4, %p1962_p1  ;;  %s189_s28 = sadd.s32 1, %s1324_s20 }
  0x3e   : > { %s2085_s2 = smov (%p48_p5, %s2083_s2), 0  ;;  %p1643_p11 = por %p148_p7, %p1961_p2 }
  0x3f   : > { %2006 = sst [smem:[#allocation37_spill]] %s2085_s2  ;;  %p199_p3 = scmp.ne.s32.totalorder %s1324_s20, %s1320_s19 }
  0x40   : > { %s50_s0 = ssub.s32 %s1396_s13, %s2085_s2  ;;  %p205_p12 = scmp.ne.s32.totalorder %s1320_s19, %s1316_s18 }
  0x41   : > { %s52_s21 = sor.u32 %s1562_s5, %s50_s0  ;;  %p133_p13 = scmp.eq.s32.totalorder %s50_s0, 0 }
  0x42   : > { %p1654_p4 = scmp.eq.s32.totalorder %s52_s21, 0  ;;  %s186_s10 = sor.u32 %s1585_s16, %s50_s0 }
  0x43   : > { %s1660_s9 = scalar_select %p133_p13, %s1336_s23, %s135_s25  }
  0x44   : > { %p187_p5 = scmp.eq.s32.totalorder %s186_s10, 0  ;;  %p1664_p7 = por %p200_p6, %p199_p3 }
  0x45   : > { %2009 = sst [smem:[#allocation38_spill]] %s1660_s9  ;;  %p206_p2 = scmp.eq.s32.totalorder %s739_s4, 11 }
  0x46   : > { %s2010_s1 = scalar_select %p1664_p7, 1, 0 }
  0x47   : > { %s1669_s5 = scalar_select %p187_p5, %s1324_s20, %s189_s28  }
  0x48   : > { %2011 = sst [smem:[#allocation39_spill]] %s2010_s1  ;;  %p1671_p1 = por %p206_p2, %p205_p12 }
  0x49   : > { %2012 = sst [smem:[#allocation40_spill]] %s1669_s5  ;;  %s293_s25 = sand.u32 1, %s1336_s23  }
  0x4a   : > { %s2013_s0 = scalar_select %p1671_p1, 1, 0 }
  0x4b   : > { %s750_s10 = sshll.u32 %s293_s25, 4  ;;  %s770_s21 = sshll.u32 %s1396_s13, 4 }
  0x4c   : > { %2014 = sst [smem:[#allocation41_spill]] %s2013_s0  ;;  %s295_s9 = scalar_lea.vmem [#allocation9], %s750_s10 }
  0x4d   : > { %s2015_s3 = sld [smem:[#allocation46_spill]]  ;;  %s303_s5 = sshll.u32 %s295_s9, 4  ;;  %s304_s5 = int_to_ptr.vmem [resolvable:$true] %s303_s5 }
  0x4e   : > { %p827_p2 = pnand %p837_p9, %p1634_p10  ;;  %s2016_s23 = sand.u32 1, %s1400_s14  }
  0x4f   : > { %s1686_s20 = scalar_lea.sflag [#allocation10], %s2016_s23  ;;  %s2017_s25 = smov 8  }
  0x50   : > { %s2018_s0 = smov 128   ;;  %s55_s29 = sadd.s32 1, %s1372_s7 }
  0x51   : > { %p62_p6 = scmp.ne.s32.totalorder %s1372_s7, %s1368_s6  ;;  %p2020_p3 = scmp.eq.s32.totalorder %s1400_s14, 0 }
  0x52   : > { %s1698_s2 = scalar_select %p1654_p4, %s1372_s7, %s55_s29  }
  0x53   : > { %s300_s4 = scalar_lea.hbm %s2015_s3, %s770_s21  ;;  %p1702_p12 = por %p2020_p3, %p62_p6 }
  0x54   : > { %s301_s28 = sshll.u32 %s300_s4, 4  ;;  %2019 = sst [smem:[#allocation42_spill]] %s1698_s2  ;;  %s302_s28 = int_to_ptr.hbm [resolvable:$true] %s301_s28 }
  0x55   : > { %829 = dma.hbm_to_vmem [thread:$0]  (!%p827_p2), %s302_s28, 256, %s304_s5, %s1686_s20, %s2018_s0, %s2018_s0, %s2017_s25  }
  0x56   : > { %p68_p10 = scmp.ne.s32.totalorder %s1368_s6, %s1364_s30  ;;  %s226_s23 = sand.u32 1, %s1372_s7  }
  0x57   : > { %s769_s26 = sshll.u32 %s1396_s13, 2  ;;  %p2022_p13 = scmp.eq.s32.totalorder %s1549_s15, 0 }
  0x58   : > { %s2023_s10 = sld [smem:[#allocation25_spill]]  ;;  %s742_s21 = sshll.u32 %s226_s23, 4 }
  0x59   : > { %p1712_p5 = por %p2022_p13, %p68_p10  ;;  %s2025_s8 = sld [smem:[#allocation24_spill]] }
  0x5a   : > { %s2026_s4 = sld [smem:[#allocation23_spill]]  ;;  %s235_s28 = sadd.s32 %s1388_s11, %s769_s26 }
  0x5b   : > { %s745_s29 = sshll.u32 %s235_s28, 3  ;;  %s2027_s30 = sld [smem:[#allocation43_spill]] }
  0x5c   : > { %s230_s13 = scalar_lea.vmem [#allocation3], %s742_s21  ;;  %p818_p4 = pnand %p837_p9, %p1702_p12 }
  0x5d   : > { %s240_s18 = sshll.u32 %s230_s13, 4  ;;  %s227_s19 = scalar_lea.sflag [#allocation4], %s226_s23  ;;  %s241_s18 = int_to_ptr.vmem [resolvable:$true] %s240_s18 }
  0x5e   : > { %s1405_s26 = smov 256   ;;  %p107_p2 = scmp.eq.s32.totalorder %s1585_s16, 0 }
  0x5f   : > { %s109_s3 = sadd.s32 1, %s2023_s10  ;;  %p116_p6 = scmp.ne.s32.totalorder %s2023_s10, %s2025_s8 }
  0x60   : > { %p122_p3 = scmp.ne.s32.totalorder %s2025_s8, %s2026_s4  ;;  %p2028_p10 = scmp.eq.s32.totalorder %s1400_s14, 0 }
  0x61   : > { %s237_s7 = scalar_lea.hbm %s2027_s30, %s745_s29  ;;  %p2029_p1 = scmp.eq.s32.totalorder %s1549_s15, 0 }
  0x62   : > { %s238_s1 = sshll.u32 %s237_s7, 4  ;;  %p118_p13 = por %p116_p6, %p2028_p10  ;;  %s239_s1 = int_to_ptr.hbm [resolvable:$true] %s238_s1 }
  0x63   : > { %820 = dma.hbm_to_vmem [thread:$0]  (!%p818_p4), %s239_s1, 256, %s241_s18, %s227_s19, %s1405_s26, %s2018_s0, %s2017_s25  }
  0x64   : > { %s1733_s13 = scalar_select %p107_p2, %s2023_s10, %s109_s3  }
  0x65   : > { %p1739_p7 = por %p122_p3, %p2029_p1  ;;  %s276_s2 = sand.u32 1, %s2023_s10  }
  0x66   : > { %s2031_s21 = sld [smem:[#allocation45_spill]]  ;;  %s277_s19 = scalar_lea.vmem [#allocation8], %s276_s2 }
  0x67   : > { %s284_s16 = sshll.u32 %s277_s19, 4  ;;  %p824_p12 = pnand %p837_p9, %p118_p13  ;;  %s285_s16 = int_to_ptr.vmem [resolvable:$true] %s284_s16 }
  0x68   : > { %s753_s8 = sshll.u32 %s276_s2, 7  ;;  %s754_s4 = sshll.u32 %s1392_s12, 3 }
  0x69   : > { %s317_s28 = scalar_lea.vmem [#allocation11], %s753_s8  ;;  %s2032_s10 = sld [smem:[#allocation47_spill]] }
  0x6a   : > { %s324_s29 = sshll.u32 %s317_s28, 4  ;;  %s2033_s23 = smov 384   ;;  %s325_s29 = int_to_ptr.vmem [resolvable:$true] %s324_s29 }
  0x6b   : > { %s338_s2 = sand.u32 (!%p1618_p0), 1, %s1368_s6  }
  0x6c   : > { %s280_s1 = scalar_lea.hbm %s2031_s21, %s1392_s12  ;;  %s339_s21 = scalar_lea.sflag (!%p1618_p0), [#allocation4], %s338_s2 }
  0x6d   : > { %s282_s18 = sshll.u32 %s280_s1, 4  ;;  %336 = sbr.rel (%p1618_p0) target bundleno = 508 (0x1fc), region = 40  ;;  %s283_s18 = int_to_ptr.hbm [resolvable:$true] %s282_s18 }
  0x6e   : > { %826 = dma.hbm_to_vmem [thread:$0]  (!%p824_p12), %s283_s18, 16, %s285_s16, %s1609_s24  }
  0x6f   : > { %s321_s3 = scalar_lea.hbm %s2032_s10, %s754_s4  ;;  %s1762_s24 = sshll.u32 (!%p1618_p0), %s338_s2, 4 }
  0x70   : > { %s322_s9 = sshll.u32 %s321_s3, 4  ;;  %s342_s1 = scalar_lea.vmem (!%p1618_p0), [#allocation3], %s1762_s24  ;;  %s323_s9 = int_to_ptr.hbm [resolvable:$true] %s322_s9 }
  0x71   : > { %832 = dma.hbm_to_vmem [thread:$0]  (!%p824_p12), %s323_s9, 2048, %s325_s29, %s1686_s20, %s2033_s23, %s2018_s0, %s2017_s25  }
  0x72   : > { %1291 = dma.done.wait (%p1712_p5), %s339_s21, 256  }
  0x73   : > { %1293 = vsyncadd (%p1712_p5), %s339_s21, 4294967040  ;;  %s2034_s18 = sld [smem:[#allocation26_spill]]  ;;  %s348_s20 = sand.u32 1, %s1549_s15  }
  0x74   : > { %s349_s25 = scalar_lea.sflag [#allocation7], %s348_s20 }
  0x79   : > { %s350_s0 = sand.u32 1, %s2034_s18  }
  0x7a   : > { %s757_s27 = sshll.u32 %s350_s0, 7 }
  0x7b   : > { %s1771_s16 = scalar_lea.vmem [#allocation6], %s757_s27 }
  0x7c   : > { %1295 = dma.done.wait (%p1579_p8), %s349_s25, 2048  }
  0x7d   : > { %1297 = vsyncadd (%p1579_p8), %s349_s25, 4294965248  ;;  %s2036_s8 = sld [smem:[#allocation24_spill]] }
  0x83   : > { %s360_s4 = sand.u32 1, %s2036_s8  }
  0x84   : > { %s1778_s28 = scalar_lea.vmem [#allocation8], %s360_s4 }
  0x85   : > { %1299 = dma.done.wait (%p1739_p7), %s349_s25, 16  }
  0x86   : > { %1301 = vsyncadd (%p1739_p7), %s349_s25, 4294967280  ;;  %s369_s15 = sand.u32 1, %s1332_s22   ;;  %s368_s29 = scalar_lea.sflag [#allocation10], %s348_s20 }
  0x87   : > { %s1785_s5 = sshll.u32 %s369_s15, 4 }
  0x88   : > { %s371_s30 = scalar_lea.vmem [#allocation9], %s1785_s5 }
  0x89   : > { %1303 = dma.done.wait (%p1643_p11), %s368_s29, 256  }
  0x8a   : > { %1305 = vsyncadd (%p1643_p11), %s368_s29, 4294967040  ;;  %s759_s26 = sshll.u32 %s360_s4, 7 }
  0x8b   : > { %s1792_s10 = scalar_lea.vmem [#allocation11], %s759_s26 }
  0x8c   : > { %1307 = dma.done.wait (%p1739_p7), %s368_s29, 2048  }
  0x8d   : > { %1309 = vsyncadd (%p1739_p7), %s368_s29, 4294965248  ;;  %s2037_s3 = sld [smem:[#allocation20_spill]] }
  0x8e   : > { %s2038_s21 = sld [smem:[#allocation29_spill]] }
  0x93   : > { %s425_s9 = sand.u32 1, %s2037_s3  }
  0x94   : > { %s760_s23 = sshll.u32 %s425_s9, 4  ;;  %p761_p1 = scmp.ne.s32.totalorder %s2038_s21, 0 }
  0x95   : > { %s1801_s2 = scalar_lea.vmem [#allocation12], %s760_s23 }
  0x96   : > { %435 = sbr.rel (%p761_p1) target bundleno = 158 (0x9e), region = 64 }
  0x9b   : > { %v1406_v0 = vmov 0.0  }
  0x9c   : > { %436 = vst [vmem:[#allocation2] sm:$0xff] %v1406_v0 }
  0x9d   : > { %437 = vst [vmem:[#allocation2 + $0x8] sm:$0xff] %v1406_v0 }
  0x9e PF: > { %v457_v1 = vld [vmem:[%s1771_s16 + $0x78] sm:$0xff]  ;;  %v456_v2 = vld [vmem:[%s1771_s16 + $0x70] sm:$0xff]  ;;  %v455_v3 = vld [vmem:[%s1771_s16 + $0x68] sm:$0xff]  ;;  %s2039_s17 = sld [smem:[#allocation29_spill]] }
  0x9f   : > { %458 = vmatpush.msra.mxu0 %v457_v1  ;;  %771 = vmatpush.msra.mxu1 %v457_v1  ;;  %v454_v4 = vld [vmem:[%s1771_s16 + $0x60] sm:$0xff]  ;;  %v453_v5 = vld [vmem:[%s1771_s16 + $0x58] sm:$0xff]  ;;  %v452_v6 = vld [vmem:[%s1771_s16 + $0x50] sm:$0xff] }
  0xa0   : > { %v451_v7 = vld [vmem:[%s1771_s16 + $0x48] sm:$0xff]  ;;  %v450_v8 = vld [vmem:[%s1771_s16 + $0x40] sm:$0xff]  ;;  %v449_v9 = vld [vmem:[%s1771_s16 + $0x38] sm:$0xff] }
  0xa1   : > { %459 = vmatpush.msra.mxu0 %v456_v2  ;;  %772 = vmatpush.msra.mxu1 %v456_v2  ;;  %v448_v10 = vld [vmem:[%s1771_s16 + $0x30] sm:$0xff]  ;;  %v447_v11 = vld [vmem:[%s1771_s16 + $0x28] sm:$0xff]  ;;  %v446_v12 = vld [vmem:[%s1771_s16 + $0x20] sm:$0xff] }
  0xa2   : > { %v445_v13 = vld [vmem:[%s1771_s16 + $0x18] sm:$0xff]  ;;  %v444_v14 = vld [vmem:[%s1771_s16 + $0x10] sm:$0xff]  ;;  %v443_v15 = vld [vmem:[%s1771_s16 + $0x8] sm:$0xff] }
  0xa3   : > { %460 = vmatpush.msra.mxu0 %v455_v3  ;;  %773 = vmatpush.msra.mxu1 %v455_v3  ;;  %v442_v16 = vld [vmem:[%s1771_s16] sm:$0xff]  ;;  %v441_v18 = vld [vmem:[%s342_s1 + $0x8] sm:$0xff]  ;;  %v438_v19 = vld [vmem:[#allocation2] sm:$0xff] }
  0xa4   : > { %v440_v17 = vld [vmem:[%s342_s1] sm:$0xff]  ;;  %v439_v20 = vld [vmem:[#allocation2 + $0x8] sm:$0xff]  ;;  %p762_p8 = scmp.ne.s32.totalorder %s2039_s17, 1 }
  0xa5   : > { %461 = vmatpush.msra.mxu0 %v454_v4  ;;  %774 = vmatpush.msra.mxu1 %v454_v4 }
  0xa7   : > { %462 = vmatpush.msra.mxu0 %v453_v5  ;;  %775 = vmatpush.msra.mxu1 %v453_v5 }
  0xa9   : > { %463 = vmatpush.msra.mxu0 %v452_v6  ;;  %776 = vmatpush.msra.mxu1 %v452_v6 }
  0xab   : > { %464 = vmatpush.msra.mxu0 %v451_v7  ;;  %777 = vmatpush.msra.mxu1 %v451_v7 }
  0xad   : > { %465 = vmatpush.msra.mxu0 %v450_v8  ;;  %778 = vmatpush.msra.mxu1 %v450_v8 }
  0xaf   : > { %466 = vmatpush.msra.mxu0 %v449_v9  ;;  %779 = vmatpush.msra.mxu1 %v449_v9 }
  0xb1   : > { %467 = vmatpush.msra.mxu0 %v448_v10  ;;  %780 = vmatpush.msra.mxu1 %v448_v10 }
  0xb3   : > { %468 = vmatpush.msra.mxu0 %v447_v11  ;;  %781 = vmatpush.msra.mxu1 %v447_v11 }
  0xb5   : > { %469 = vmatpush.msra.mxu0 %v446_v12  ;;  %782 = vmatpush.msra.mxu1 %v446_v12 }
  0xb7   : > { %470 = vmatpush.msra.mxu0 %v445_v13  ;;  %783 = vmatpush.msra.mxu1 %v445_v13 }
  0xb9   : > { %471 = vmatpush.msra.mxu0 %v444_v14  ;;  %784 = vmatpush.msra.mxu1 %v444_v14 }
  0xbb   : > { %472 = vmatpush.msra.mxu0 %v443_v15  ;;  %785 = vmatpush.msra.mxu1 %v443_v15 }
  0xbd   : > { %473 = vmatpush.msra.mxu0 %v442_v16  ;;  %786 = vmatpush.msra.mxu1 %v442_v16 }
  0xbe   : > { %474 = vmatmul.f32.vlgmr.msra.gmra.mxu0 %v440_v17  ;;  %477 = vmatmul.f32.vlgmr.msra.gmra.mxu1 %v441_v18 }
 0x13b   : > { %v475_v21 = vpop.f32.mrf.mxu0  ;;  %v478_v22 = vpop.f32.mrf.mxu1  ;;  %488 = sbr.rel (%p762_p8) target bundleno = 482 (0x1e2), region = 68 }
 0x13c   : > { %v481_v23 = vadd.f32 %v475_v21, %v438_v19  ;;  %v482_v24 = vadd.f32 %v478_v22, %v439_v20 }
 0x13e   : > { %483 = vst [vmem:[#allocation2] sm:$0xff] %v481_v23 }
 0x13f   : > { %484 = vst [vmem:[#allocation2 + $0x8] sm:$0xff] %v482_v24 }
 0x140   : > { %v506_v25 = vld [vmem:[%s1792_s10 + $0x78] sm:$0xff]  ;;  %v505_v26 = vld [vmem:[%s1792_s10 + $0x70] sm:$0xff]  ;;  %v504_v27 = vld [vmem:[%s1792_s10 + $0x68] sm:$0xff] }
 0x141   : > { %507 = vmatpush.msra.mxu0 %v506_v25  ;;  %787 = vmatpush.msra.mxu1 %v506_v25  ;;  %v503_v28 = vld [vmem:[%s1792_s10 + $0x60] sm:$0xff]  ;;  %v502_v29 = vld [vmem:[%s1792_s10 + $0x58] sm:$0xff]  ;;  %v501_v30 = vld [vmem:[%s1792_s10 + $0x50] sm:$0xff] }
 0x142   : > { %v500_v31 = vld [vmem:[%s1792_s10 + $0x48] sm:$0xff]  ;;  %v499_v32 = vld [vmem:[%s1792_s10 + $0x40] sm:$0xff]  ;;  %v498_v33 = vld [vmem:[%s1792_s10 + $0x38] sm:$0xff] }
 0x143   : > { %508 = vmatpush.msra.mxu0 %v505_v26  ;;  %788 = vmatpush.msra.mxu1 %v505_v26  ;;  %v497_v34 = vld [vmem:[%s1792_s10 + $0x30] sm:$0xff]  ;;  %v496_v35 = vld [vmem:[%s1792_s10 + $0x28] sm:$0xff]  ;;  %v495_v36 = vld [vmem:[%s1792_s10 + $0x20] sm:$0xff] }
 0x144   : > { %v494_v37 = vld [vmem:[%s1792_s10 + $0x18] sm:$0xff]  ;;  %v493_v38 = vld [vmem:[%s1792_s10 + $0x10] sm:$0xff]  ;;  %v492_v39 = vld [vmem:[%s1792_s10 + $0x8] sm:$0xff] }
 0x145   : > { %509 = vmatpush.msra.mxu0 %v504_v27  ;;  %789 = vmatpush.msra.mxu1 %v504_v27  ;;  %v491_v40 = vld [vmem:[%s1792_s10] sm:$0xff]  ;;  %v490_v42 = vld [vmem:[%s371_s30 + $0x8] sm:$0xff] }
 0x146   : > { %v489_v41 = vld [vmem:[%s371_s30] sm:$0xff]  ;;  %v1023_v43 = vld [vmem:[%s1778_s28] ss:$0 sm:$0xff] }
 0x147   : > { %510 = vmatpush.msra.mxu0 %v503_v28  ;;  %790 = vmatpush.msra.mxu1 %v503_v28  ;;  %v530_v44 = vld [vmem:[#allocation2] sm:$0xff]  ;;  %v531_v45 = vld [vmem:[#allocation2 + $0x8] sm:$0xff] }
 0x148   : > { %v536_v46 = vadd.f32 %v1023_v43, %v530_v44  ;;  %v537_v47 = vadd.f32 %v1023_v43, %v531_v45 }
 0x149   : > { %511 = vmatpush.msra.mxu0 %v502_v29  ;;  %791 = vmatpush.msra.mxu1 %v502_v29 }
 0x14b   : > { %512 = vmatpush.msra.mxu0 %v501_v30  ;;  %792 = vmatpush.msra.mxu1 %v501_v30 }
 0x14d   : > { %513 = vmatpush.msra.mxu0 %v500_v31  ;;  %793 = vmatpush.msra.mxu1 %v500_v31 }
 0x14f   : > { %514 = vmatpush.msra.mxu0 %v499_v32  ;;  %794 = vmatpush.msra.mxu1 %v499_v32 }
 0x151   : > { %515 = vmatpush.msra.mxu0 %v498_v33  ;;  %795 = vmatpush.msra.mxu1 %v498_v33 }
 0x153   : > { %516 = vmatpush.msra.mxu0 %v497_v34  ;;  %796 = vmatpush.msra.mxu1 %v497_v34 }
 0x155   : > { %517 = vmatpush.msra.mxu0 %v496_v35  ;;  %797 = vmatpush.msra.mxu1 %v496_v35 }
 0x157   : > { %518 = vmatpush.msra.mxu0 %v495_v36  ;;  %798 = vmatpush.msra.mxu1 %v495_v36 }
 0x159   : > { %519 = vmatpush.msra.mxu0 %v494_v37  ;;  %799 = vmatpush.msra.mxu1 %v494_v37 }
 0x15b   : > { %520 = vmatpush.msra.mxu0 %v493_v38  ;;  %800 = vmatpush.msra.mxu1 %v493_v38 }
 0x15d   : > { %521 = vmatpush.msra.mxu0 %v492_v39  ;;  %801 = vmatpush.msra.mxu1 %v492_v39 }
 0x15f   : > { %522 = vmatpush.msra.mxu0 %v491_v40  ;;  %802 = vmatpush.msra.mxu1 %v491_v40 }
 0x160   : > { %523 = vmatmul.f32.vlgmr.msra.gmra.mxu0 %v489_v41  ;;  %526 = vmatmul.f32.vlgmr.msra.gmra.mxu1 %v490_v42 }
 0x1dd   : > { %v524_v48 = vpop.f32.mrf.mxu0  ;;  %v527_v49 = vpop.f32.mrf.mxu1 }
 0x1de   : > { %v538_v50 = vadd.f32 %v536_v46, %v524_v48  ;;  %v539_v51 = vadd.f32 %v537_v47, %v527_v49 }
 0x1e0   : > { %540 = vst [vmem:[%s1801_s2] sm:$0xff] %v538_v50 }
 0x1e1   : > { %541 = vst [vmem:[%s1801_s2 + $0x8] sm:$0xff] %v539_v51 }
 0x1e2 PF: > { %s2040_s7 = sld [smem:[#allocation31_spill]]  ;;  %s557_s20 = sshll.u32 %s1801_s2, 4  ;;  %s558_s20 = int_to_ptr.vmem [resolvable:$true] %s557_s20 }
 0x1e3   : > { %s2041_s24 = sld [smem:[#allocation30_spill]]  ;;  %s543_s5 = scalar_lea.sflag [#allocation5], %s425_s9 }
 0x1e4   : > { %s2043_s18 = sld [smem:[#allocation39_spill]] }
 0x1e5   : > { %s2044_s8 = sld [smem:[#allocation48_spill]] }
 0x1e8   : > { %s804_s19 = smul.u32 6, %s2040_s7 }
 0x1ea   : > { %s554_s0 = sadd.s32 %s2041_s24, %s804_s19  ;;  %p2046_p0 = scmp.ne.s32.totalorder %s2043_s18, 0 }
 0x1eb   : > { %s766_s27 = sshll.u32 %s554_s0, 3  ;;  %s2045_s4 = smov %s2044_s8 }
 0x1ec   : > { %s556_s28 = scalar_lea.hbm %s2044_s8, %s766_s27  ;;  %s1194_s3 = scalar_lea.hbm %s2045_s4, 96 }
 0x1ed   : > { %s559_s15 = sshll.u32 %s556_s28, 4  ;;  %s560_s15 = int_to_ptr.hbm [resolvable:$true] %s559_s15 }
 0x1ee   : > { %s1188_s29 = sshra.s32 %s560_s15, 4  ;;  %s1189_s29 = int_to_ptr.hbm [resolvable:$true] %s1188_s29 }
 0x1ef   : > { %s1190_s30 = scalar_lea.hbm %s1189_s29, 16  ;;  %p1195_p5 = scmp.lt.s32.totalorder %s1189_s29, %s2045_s4 }
 0x1f0   : > { %p1191_p9 = scmp.ne.s32.totalorder %s1189_s29, %s1190_s30  ;;  %p1196_p4 = scmp.lt.s32.totalorder %s1194_s3, %s1190_s30 }
 0x1f2   : > { %p1192_p11 = pnand %p1191_p9, %p2046_p0  ;;  %p1197_p2 = por %p1196_p4, %p1195_p5 }
 0x1f4   : > { %p1193_p7 = pneg %p1192_p11 }
 0x1f6   : > { %p1198_p6 = pnand %p1197_p2, %p1193_p7 }
 0x1f8   : > { %1201 = shalt.err (!%p1198_p6)
}
 0x1f9   : > { %s1407_s9 = smov 128   ;;  %s1408_s21 = smov 384  }
 0x1fa   : > { %s1409_s17 = smov 8  }
 0x1fb   : > { %815 = dma.vmem_to_hbm [thread:$0]  (%p2046_p0), %s558_s20, 256, %s560_s15, %s543_s5, %s1407_s9, %s1408_s21, %s1409_s17  }
 0x1fc PF: > { %s2047_s7 = sld [smem:[#allocation19_spill]]  ;;  %p838_p3 = scmp.ge.s32.totalorder %s1400_s14, 2 }
 0x1fd   : > { %s2048_s24 = sld [smem:[#allocation41_spill]] }
 0x202   : > { %s574_s1 = sand.u32 1, %s2047_s7  }
 0x203   : > { %p2049_p10 = scmp.ne.s32.totalorder %s2048_s24, 0  ;;  %s575_s19 = scalar_lea.sflag [#allocation5], %s574_s1 }
 0x205   : > { %p834_p13 = pnand %p838_p3, %p2049_p10 }
 0x207   : > { %p835_p12 = pneg %p834_p13 }
 0x209   : > { %1311 = dma.done.wait (%p835_p12), %s575_s19, 256  }
 0x20a   : > { %1313 = vsyncadd (%p835_p12), %s575_s19, 4294967040  ;;  %s27_s14 = sadd.s32 1, %s1400_s14   ;;  %s2051_s18 = sld [smem:[#allocation20_spill]] }
 0x20b   : > { %p1871_p1 = scmp.ge.s32.totalorder %s27_s14, 14   ;;  %s2052_s19 = sld [smem:[#allocation21_spill]] }
 0x20c   : > { %s2053_s20 = sld [smem:[#allocation40_spill]]  ;;  %s2065_s21 = smov %s1332_s22 }
 0x20d   : > { %s2054_s27 = sld [smem:[#allocation22_spill]]  ;;  %s2069_s26 = smov %s1733_s13 }
 0x20e   : > { %s2055_s23 = sld [smem:[#allocation38_spill]]  ;;  %s2071_s30 = smov %s1368_s6 }
 0x20f   : > { %s2056_s24 = sld [smem:[#allocation24_spill]]  ;;  %s2074_s9 = smov %s1392_s12 }
 0x210   : > { %s2057_s25 = sld [smem:[#allocation25_spill]] }
 0x211   : > { %s2058_s16 = sld [smem:[#allocation26_spill]] }
 0x212   : > { %s2059_s28 = sld [smem:[#allocation27_spill]] }
 0x213   : > { %s2060_s29 = sld [smem:[#allocation36_spill]]  ;;  %s2067_s22 = smov %s2054_s27 }
 0x214   : > { %s2061_s8 = sld [smem:[#allocation28_spill]] }
 0x215   : > { %s2062_s7 = sld [smem:[#allocation42_spill]] }
 0x216   : > { %s2063_s10 = sld [smem:[#allocation32_spill]] }
 0x217   : > { %s2064_s15 = sld [smem:[#allocation33_spill]]  ;;  %s2070_s27 = smov %s2058_s16 }
 0x218   : > { %s2066_s5 = sld [smem:[#allocation34_spill]] }
 0x219   : > { %s2068_s3 = sld [smem:[#allocation37_spill]] }
 0x21a   : > { %s2072_s6 = smov %s2061_s8  ;;  %s2073_s8 = smov %s1388_s11 }
 0x21b   :  { %26 = sbr.rel (!%p1871_p1) target bundleno = 25 (0x19), region = 141 }
 0x21d   : > { %s2075_s11 = smov %s2064_s15 }
 0x21e   : > { %s2076_s12 = smov %s2066_s5 }
 0x21f   : > { %s2077_s13 = smov %s2068_s3 }
 0x220   :  { %581 = vsyncpa [#allocation4], 1 }
 0x221   :  { %583 = vsyncpa [#allocation4 + $0x1], 1 }
 0x222   :  { %584 = vsyncpa [#allocation7], 1 }
 0x223   :  { %586 = vsyncpa [#allocation7 + $0x1], 1 }
 0x224   :  { %587 = vsyncpa [#allocation10], 1 }
 0x225   :  { %589 = vsyncpa [#allocation10 + $0x1], 1 }
 0x226   :  { %590 = vsyncpa [#allocation5], 1 }
 0x227   :  { %592 = vsyncpa [#allocation5 + $0x1], 1 }

</bundles_post_ra>
